<compile_context>
chip_gen: v7x
topology: tpu7x:2x2x1
jax: 0.10.0
libtpu: 0.0.40
codegen_flags: <defaults>
</compile_context>

<pallas_src>
import jax
import jax.numpy as jnp
from jax.experimental import pallas as pl
from jax.experimental.pallas import tpu as pltpu


NEG_SLOPE = 0.2


def _round_up(x, m):
    return ((x + m - 1) // m) * m


def critic_kernel(s_ref, a_ref, w1s_ref, w1a_ref, b1_ref, w2_ref, b2_ref, out_ref):
    # Hidden layer with the concat fused away:
    #   h = s @ W1_s + a @ W1_a + b1   (f32 accumulation on the MXU)
    h = jnp.dot(s_ref[...], w1s_ref[...], preferred_element_type=jnp.float32)
    h = h + jnp.dot(a_ref[...], w1a_ref[...], preferred_element_type=jnp.float32)
    h = h + b1_ref[...]
    # LeakyReLU(negative_slope=0.2) in f32 on the VPU.
    h = jnp.where(h > 0, h, NEG_SLOPE * h)
    # Output layer: (TB, H) @ (H, A) + (1, A).
    o = jnp.dot(h.astype(w2_ref.dtype), w2_ref[...],
                preferred_element_type=jnp.float32)
    out_ref[...] = (o + b2_ref[...]).astype(out_ref.dtype)


def init_params(key, state_dim, action_dim, hidden=100):
    """PyTorch-default Linear init; weights stored pre-transposed (in, out)."""
    d_in = state_dim + action_dim
    k1, k2, k3, k4 = jax.random.split(key, 4)
    bound1 = 1.0 / jnp.sqrt(d_in)
    bound2 = 1.0 / jnp.sqrt(hidden)
    w1 = jax.random.uniform(k1, (d_in, hidden), jnp.float32, -bound1, bound1)
    b1 = jax.random.uniform(k2, (1, hidden), jnp.float32, -bound1, bound1)
    w2 = jax.random.uniform(k3, (hidden, action_dim), jnp.float32, -bound2, bound2)
    b2 = jax.random.uniform(k4, (1, action_dim), jnp.float32, -bound2, bound2)
    return (w1, b1, w2, b2)


def prepare_params(params, state_dim, hidden_pad=128, compute_dtype=jnp.float32):
    """Split W1 for the fused concat and zero-pad hidden to a lane-dense 128.

    Zero-padding is numerically exact: padded W2 rows are zero, so the padded
    hidden units never contribute to the output.
    """
    w1, b1, w2, b2 = params
    hidden = w1.shape[1]
    hp = max(hidden_pad, _round_up(hidden, 128))
    pad_h = hp - hidden

    w1_s = jnp.pad(w1[:state_dim], ((0, 0), (0, pad_h))).astype(compute_dtype)
    w1_a = jnp.pad(w1[state_dim:], ((0, 0), (0, pad_h))).astype(compute_dtype)
    b1_p = jnp.pad(b1, ((0, 0), (0, pad_h))).astype(jnp.float32)
    w2_p = jnp.pad(w2, ((0, pad_h), (0, 0))).astype(compute_dtype)
    b2_p = b2.astype(jnp.float32)
    return (w1_s, w1_a, b1_p, w2_p, b2_p)


def critic_forward(s, a, prepped, *, tb=512):
    """s: (B, state_dim), a: (B, action_dim). Returns (B, action_dim) f32."""
    w1_s, w1_a, b1, w2, b2 = prepped
    B, S = s.shape
    A_in = a.shape[1]
    H, A_out = w2.shape
    cdt = w1_s.dtype

    s = s.astype(cdt)
    a = a.astype(cdt)

    # Batch tile: multiple of 8 (sublane), clamped to the (row-padded) batch.
    TB = min(_round_up(int(tb), 8), _round_up(B, 8))
    B_pad = _round_up(B, TB)
    if B_pad != B:
        s = jnp.pad(s, ((0, B_pad - B), (0, 0)))
        a = jnp.pad(a, ((0, B_pad - B), (0, 0)))

    grid = (B_pad // TB,)

    out = pl.pallas_call(
        critic_kernel,
        out_shape=jax.ShapeDtypeStruct((B_pad, A_out), jnp.float32),
        grid=grid,
        in_specs=[
            pl.BlockSpec((TB, S), lambda i: (i, 0)),       # s      (pipelined)
            pl.BlockSpec((TB, A_in), lambda i: (i, 0)),    # a      (pipelined)
            pl.BlockSpec((S, H), lambda i: (0, 0)),        # W1_s   (resident)
            pl.BlockSpec((A_in, H), lambda i: (0, 0)),     # W1_a   (resident)
            pl.BlockSpec((1, H), lambda i: (0, 0)),        # b1     (resident)
            pl.BlockSpec((H, A_out), lambda i: (0, 0)),    # W2     (resident)
            pl.BlockSpec((1, A_out), lambda i: (0, 0)),    # b2     (resident)
        ],
        out_specs=pl.BlockSpec((TB, A_out), lambda i: (i, 0)),
        compiler_params=pltpu.CompilerParams(
            # Batch axis is embarrassingly parallel -> megacore sharding on v7x.
            dimension_semantics=("parallel",),
        ),
    )(s, a, w1_s, w1_a, b1, w2, b2)

    return out[:B]


def critic_reference(s, a, params):
    w1, b1, w2, b2 = params
    x = jnp.concatenate([s, a], axis=1).astype(jnp.float32)
    h = x @ w1 + b1
    h = jnp.where(h > 0, h, NEG_SLOPE * h)
    return h @ w2 + b2


if __name__ == "__main__":
    batch, state_dim, action_dim = 8, 16, 4
    key = jax.random.PRNGKey(0)
    ks, ka, kp = jax.random.split(key, 3)
    s = jax.random.normal(ks, (batch, state_dim), jnp.float32)
    a = jax.random.normal(ka, (batch, action_dim), jnp.float32)
    params = init_params(kp, state_dim, action_dim)
    ref = critic_reference(s, a, params)

    # f32 path (exact vs reference up to f32 rounding).
    prepped_f32 = prepare_params(params, state_dim, compute_dtype=jnp.float32)
    out = jax.block_until_ready(critic_forward(s, a, prepped_f32))
    assert out.shape == (batch, action_dim)
    assert jnp.allclose(out, ref, atol=1e-5, rtol=1e-5), "f32 mismatch vs reference"

    # bf16 compute path (v6e/v7x bandwidth optimization), relaxed tolerance.
    prepped_bf16 = prepare_params(params, state_dim, compute_dtype=jnp.bfloat16)
    out_bf16 = jax.block_until_ready(critic_forward(s, a, prepped_bf16))
    assert jnp.allclose(out_bf16, ref, atol=5e-2, rtol=5e-2), "bf16 mismatch vs reference"

    # Larger, non-tile-multiple batch to exercise batch tiling + row padding.
    batch2 = 200
    ks2, ka2 = jax.random.split(jax.random.PRNGKey(1), 2)
    s2 = jax.random.normal(ks2, (batch2, state_dim), jnp.float32)
    a2 = jax.random.normal(ka2, (batch2, action_dim), jnp.float32)
    out2 = jax.block_until_ready(critic_forward(s2, a2, prepped_f32, tb=64))
    ref2 = critic_reference(s2, a2, params)
    assert out2.shape == (batch2, action_dim)
    assert jnp.allclose(out2, ref2, atol=1e-5, rtol=1e-5), "tiled mismatch vs reference"

    print("KERNEL_OK")
</pallas_src>

<mosaic_0001>
module attributes {stable_mosaic.version = 11 : i64} {
  func.func @critic_kernel(%arg0: i32, %arg1: memref<8x16xf32, #tpu.memory_space<vmem>>, %arg2: memref<8x4xf32, #tpu.memory_space<vmem>>, %arg3: memref<16x128xf32, #tpu.memory_space<vmem>>, %arg4: memref<4x128xf32, #tpu.memory_space<vmem>>, %arg5: memref<1x128xf32, #tpu.memory_space<vmem>>, %arg6: memref<128x4xf32, #tpu.memory_space<vmem>>, %arg7: memref<1x4xf32, #tpu.memory_space<vmem>>, %arg8: memref<8x4xf32, #tpu.memory_space<vmem>>) attributes {dimension_semantics = [#tpu.dimension_semantics<parallel>], iteration_bounds = array<i64: 1>, scalar_prefetch = 0 : i64, scratch_operands = 0 : i64, tpu.core_type = #tpu.core_type<tc>, window_params = [{transform_indices = @transform_0, window_bounds = array<i64: 8, 16>}, {transform_indices = @transform_1, window_bounds = array<i64: 8, 4>}, {pipeline_mode = #tpu.pipeline_mode<synchronous>, transform_indices = @transform_2, window_bounds = array<i64: 16, 128>}, {pipeline_mode = #tpu.pipeline_mode<synchronous>, transform_indices = @transform_3, window_bounds = array<i64: 4, 128>}, {pipeline_mode = #tpu.pipeline_mode<synchronous>, transform_indices = @transform_4, window_bounds = array<i64: 1, 128>}, {pipeline_mode = #tpu.pipeline_mode<synchronous>, transform_indices = @transform_5, window_bounds = array<i64: 128, 4>}, {pipeline_mode = #tpu.pipeline_mode<synchronous>, transform_indices = @transform_6, window_bounds = array<i64: 1, 4>}, {transform_indices = @transform_7, window_bounds = array<i64: 8, 4>}]} {
    %c0 = arith.constant 0 : index
    %c0_0 = arith.constant 0 : index
    %0 = vector.load %arg1[%c0, %c0_0] : memref<8x16xf32, #tpu.memory_space<vmem>>, vector<8x16xf32>
    %c0_1 = arith.constant 0 : index
    %c0_2 = arith.constant 0 : index
    %1 = vector.load %arg3[%c0_1, %c0_2] : memref<16x128xf32, #tpu.memory_space<vmem>>, vector<16x128xf32>
    %cst = arith.constant dense<0.000000e+00> : vector<8x128xf32>
    %2 = tpu.matmul %0, %1, %cst {dimension_numbers = #tpu.dot_dimension_numbers<[1], [0], [0], [1], [0, 0, 1, 1], [], []>} : vector<8x16xf32>, vector<16x128xf32>, vector<8x128xf32> -> vector<8x128xf32>
    %c0_3 = arith.constant 0 : index
    %c0_4 = arith.constant 0 : index
    %3 = vector.load %arg2[%c0_3, %c0_4] : memref<8x4xf32, #tpu.memory_space<vmem>>, vector<8x4xf32>
    %c0_5 = arith.constant 0 : index
    %c0_6 = arith.constant 0 : index
    %4 = vector.load %arg4[%c0_5, %c0_6] : memref<4x128xf32, #tpu.memory_space<vmem>>, vector<4x128xf32>
    %cst_7 = arith.constant dense<0.000000e+00> : vector<8x128xf32>
    %5 = tpu.matmul %3, %4, %cst_7 {dimension_numbers = #tpu.dot_dimension_numbers<[1], [0], [0], [1], [0, 0, 1, 1], [], []>} : vector<8x4xf32>, vector<4x128xf32>, vector<8x128xf32> -> vector<8x128xf32>
    %6 = arith.addf %2, %5 : vector<8x128xf32>
    %c0_8 = arith.constant 0 : index
    %c0_9 = arith.constant 0 : index
    %7 = vector.load %arg5[%c0_8, %c0_9] : memref<1x128xf32, #tpu.memory_space<vmem>>, vector<1x128xf32>
    %8 = vector.broadcast %7 : vector<1x128xf32> to vector<8x128xf32>
    %9 = arith.addf %6, %8 : vector<8x128xf32>
    %cst_10 = arith.constant 0.000000e+00 : f32
    %10 = vector.broadcast %cst_10 : f32 to vector<8x128xf32>
    %11 = arith.cmpf ogt, %9, %10 : vector<8x128xf32>
    %cst_11 = arith.constant 2.000000e-01 : f32
    %12 = vector.broadcast %cst_11 : f32 to vector<8x128xf32>
    %13 = arith.mulf %12, %9 : vector<8x128xf32>
    %14 = arith.select %11, %9, %13 : vector<8x128xi1>, vector<8x128xf32>
    %c0_12 = arith.constant 0 : index
    %c0_13 = arith.constant 0 : index
    %15 = vector.load %arg6[%c0_12, %c0_13] : memref<128x4xf32, #tpu.memory_space<vmem>>, vector<128x4xf32>
    %cst_14 = arith.constant dense<0.000000e+00> : vector<8x4xf32>
    %16 = tpu.matmul %14, %15, %cst_14 {dimension_numbers = #tpu.dot_dimension_numbers<[1], [0], [0], [1], [0, 0, 1, 1], [], []>} : vector<8x128xf32>, vector<128x4xf32>, vector<8x4xf32> -> vector<8x4xf32>
    %c0_15 = arith.constant 0 : index
    %c0_16 = arith.constant 0 : index
    %17 = vector.load %arg7[%c0_15, %c0_16] : memref<1x4xf32, #tpu.memory_space<vmem>>, vector<1x4xf32>
    %18 = vector.broadcast %17 : vector<1x4xf32> to vector<8x4xf32>
    %19 = arith.addf %16, %18 : vector<8x4xf32>
    %c0_17 = arith.constant 0 : index
    %c0_18 = arith.constant 0 : index
    %20 = vector.load %arg8[%c0_17, %c0_18] : memref<8x4xf32, #tpu.memory_space<vmem>>, vector<8x4xf32>
    tpu.vector_store %arg8[%c0_17, %c0_18], %19 {strides = array<i32>} : memref<8x4xf32, #tpu.memory_space<vmem>>, vector<8x4xf32>,
    return
  }
  func.func @transform_0(%arg0: i32) -> (i32, i32) {
    %c0_i32 = arith.constant 0 : i32
    %c0_i32_0 = arith.constant 0 : i32
    return %arg0, %c0_i32 : i32, i32
  }
  func.func @transform_1(%arg0: i32) -> (i32, i32) {
    %c0_i32 = arith.constant 0 : i32
    %c0_i32_0 = arith.constant 0 : i32
    return %arg0, %c0_i32 : i32, i32
  }
  func.func @transform_2(%arg0: i32) -> (i32, i32) {
    %c0_i32 = arith.constant 0 : i32
    %c0_i32_0 = arith.constant 0 : i32
    %c0_i32_1 = arith.constant 0 : i32
    return %c0_i32, %c0_i32_0 : i32, i32
  }
  func.func @transform_3(%arg0: i32) -> (i32, i32) {
    %c0_i32 = arith.constant 0 : i32
    %c0_i32_0 = arith.constant 0 : i32
    %c0_i32_1 = arith.constant 0 : i32
    return %c0_i32, %c0_i32_0 : i32, i32
  }
  func.func @transform_4(%arg0: i32) -> (i32, i32) {
    %c0_i32 = arith.constant 0 : i32
    %c0_i32_0 = arith.constant 0 : i32
    %c0_i32_1 = arith.constant 0 : i32
    return %c0_i32, %c0_i32_0 : i32, i32
  }
  func.func @transform_5(%arg0: i32) -> (i32, i32) {
    %c0_i32 = arith.constant 0 : i32
    %c0_i32_0 = arith.constant 0 : i32
    %c0_i32_1 = arith.constant 0 : i32
    return %c0_i32, %c0_i32_0 : i32, i32
  }
  func.func @transform_6(%arg0: i32) -> (i32, i32) {
    %c0_i32 = arith.constant 0 : i32
    %c0_i32_0 = arith.constant 0 : i32
    %c0_i32_1 = arith.constant 0 : i32
    return %c0_i32, %c0_i32_0 : i32, i32
  }
  func.func @transform_7(%arg0: i32) -> (i32, i32) {
    %c0_i32 = arith.constant 0 : i32
    %c0_i32_0 = arith.constant 0 : i32
    return %arg0, %c0_i32 : i32, i32
  }
}

</mosaic_0001>

<bundles_post_ra>
// kernel: tpu_custom_call.1
= control target key start
LH: loop header
LB: loop body
LE: loop exit
PB: predicated region body
PF: predicated region fallthrough
CT: control target
= control target key end

     0   :  { %vm35_vm0 = vcmask 1043456   ;;  %vm31_vm1 = vcmask 31744   ;;  %v396_v0 = vmov 0.0   ;;  %vm397_vm2 = vmmov 0   ;;  %s516_s3 = inlined_call_operand.vmem [shape: f32[4,128], index: 3, kind: input, shape index: {}]   ;;  %s517_s1 = inlined_call_operand.vmem [shape: f32[8,4], index: 1, kind: input, shape index: {}]   ;;  %s518_s2 = inlined_call_operand.vmem [shape: f32[16,128], index: 2, kind: input, shape index: {}]   ;;  %s519_s5 = inlined_call_operand.vmem [shape: f32[128,4], index: 5, kind: input, shape index: {}]   ;;  %s520_s0 = inlined_call_operand.vmem [shape: f32[8,16], index: 0, kind: input, shape index: {}]   ;;  %s521_s4 = inlined_call_operand.vmem [shape: f32[1,128], index: 4, kind: input, shape index: {}]   ;;  %s522_s6 = inlined_call_operand.vmem [shape: f32[1,4], index: 6, kind: input, shape index: {}]   ;;  %s523_s7 = inlined_call_operand.vmem [shape: f32[8,4], index: 7, kind: output, shape index: {}]  }
   0x1   :  { %319 = vmatprep.subr.mxu1 %v396_v0  ;;  %v30_v1 = vld [vmem:[%s516_s3] sm:$0xf]  ;;  %321 = vmatprep.mubr.msk.f32.mxu1 %vm397_vm2, %v396_v0  ;;  %v28_v4 = vld [vmem:[%s518_s2 + $0x8] sm:$0xff]  ;;  %v398_v5 = vmov 0.0|0.0   ;;  %v196_v9 = vld [vmem:[%s519_s5 + $0x10] sm:$0xff]  ;;  %vm109_vm3 = vcmask 130048  }
   0x2   :  { %v29_v2 = vld [vmem:[%s517_s1] sm:$0xff]  ;;  %320 = vmatpush3.msk.msra.mxu1 %vm35_vm0, %v30_v1  ;;  %369 = vmatprep.subr.bf16.mxu0 %v398_v5  ;;  %v195_v8 = vld [vmem:[%s519_s5 + $0x8] sm:$0xff]  ;;  %v197_v10 = vld [vmem:[%s519_s5 + $0x18] sm:$0xff] }
   0x3   :  { %v27_v3 = vld [vmem:[%s518_s2] sm:$0xff]  ;;  %322 = vmatmul.mubr.msk.f32.vlgmr.msra.gmra.mrb[0].mxu1 %vm31_vm1, %v29_v2  ;;  %366 = vmatprep.subr.bf16.mxu1 %v398_v5  ;;  %v373_v13 = vpack.c.bf16 %v197_v10, %v196_v9  ;;  %v199_v15 = vld [vmem:[%s519_s5 + $0x28] sm:$0xff]  ;;  %v200_v17 = vld [vmem:[%s519_s5 + $0x30] sm:$0xff] }
   0x4   :  { %v194_v6 = vld [vmem:[%s519_s5] sm:$0xff]  ;;  %v367_v7 = vpack.c.bf16 %v28_v4, %v27_v3  ;;  %328 = vmatprep.mubr.msk.f32.mxu1 %vm397_vm2, %v396_v0  ;;  %363 = vmatprep.mubr.msk.f32.mxu0 %vm397_vm2, %v396_v0  ;;  %v201_v18 = vld [vmem:[%s519_s5 + $0x38] sm:$0xff]  ;;  %v203_v21 = vld [vmem:[%s519_s5 + $0x48] sm:$0xff] }
   0x5   :  { %v370_v11 = vpack.c.bf16 %v195_v8, %v194_v6  ;;  %v26_v12 = vld [vmem:[%s520_s0] sm:$0xff]  ;;  %v379_v19 = vpack.c.bf16 %v201_v18, %v200_v17  ;;  %v204_v23 = vld [vmem:[%s519_s5 + $0x50] sm:$0xff]  ;;  %v205_v24 = vld [vmem:[%s519_s5 + $0x58] sm:$0xff] }
   0x6   :  { %368 = vmatpush3.bf16.msra.mxu1 %v367_v7  ;;  %v198_v14 = vld [vmem:[%s519_s5 + $0x20] sm:$0xff]  ;;  %v385_v25 = vpack.c.bf16 %v205_v24, %v204_v23  ;;  %v207_v27 = vld [vmem:[%s519_s5 + $0x68] sm:$0xff]  ;;  %v208_v29 = vld [vmem:[%s519_s5 + $0x70] sm:$0xff] }
   0x7   :  { %371 = vmatpush3.bf16.msra.mxu0 %v370_v11  ;;  %v376_v16 = vpack.c.bf16 %v199_v15, %v198_v14  ;;  %v202_v20 = vld [vmem:[%s519_s5 + $0x40] sm:$0xff]  ;;  %v209_v30 = vld [vmem:[%s519_s5 + $0x78] sm:$0xff] }
   0x8   :  { %372 = vmatprep.subr.bf16.mxu0 %v398_v5  ;;  %v382_v22 = vpack.c.bf16 %v203_v21, %v202_v20  ;;  %v206_v26 = vld [vmem:[%s519_s5 + $0x60] sm:$0xff]  ;;  %v391_v31 = vpack.c.bf16 %v209_v30, %v208_v29 }
   0x9   :  { %329 = vmatmul.mubr.msk.f32.vlgmr.msra.gmra.mrb[2].mxu1 %vm109_vm3, %v26_v12  ;;  %v388_v28 = vpack.c.bf16 %v207_v27, %v206_v26  ;;  %v295_v35 = vld [vmem:[%s521_s4] ss:$0 sm:$0xff] }
   0xa   :  { %v296_v41 = vld [vmem:[%s522_s6] ss:$0 sm:$0xff] }
   0xb   :  { %374 = vmatpush3.bf16.msra.mxu0 %v373_v13 }
   0xc   :  { %375 = vmatprep.subr.bf16.mxu0 %v398_v5 }
   0xf   :  { %377 = vmatpush3.bf16.msra.mxu0 %v376_v16 }
  0x10   :  { %378 = vmatprep.subr.bf16.mxu0 %v398_v5 }
  0x13   :  { %380 = vmatpush3.bf16.msra.mxu0 %v379_v19 }
  0x14   :  { %381 = vmatprep.subr.bf16.mxu0 %v398_v5 }
  0x17   :  { %383 = vmatpush3.bf16.msra.mxu0 %v382_v22 }
  0x18   :  { %384 = vmatprep.subr.bf16.mxu0 %v398_v5 }
  0x1b   :  { %386 = vmatpush3.bf16.msra.mxu0 %v385_v25 }
  0x1c   :  { %387 = vmatprep.subr.bf16.mxu0 %v398_v5 }
  0x1f   :  { %389 = vmatpush3.bf16.msra.mxu0 %v388_v28 }
  0x20   :  { %390 = vmatprep.subr.bf16.mxu0 %v398_v5 }
  0x23   :  { %392 = vmatpush3.bf16.msra.mxu0 %v391_v31 }
  0xd6   :  { %v105_v32 = vpop.f32.mrb[0].mxu1 }
  0xd7   :  { %v323_v33 = vpop.f32.mrb[1].mxu1 }
  0xdc   :  { %v179_v34 = vpop.f32.mrb[2].mxu1 }
  0xdd   :  { %v180_v36 = vadd.f32 %v179_v34, %v105_v32  ;;  %v330_v37 = vpop.f32.mrb[3].mxu1 }
  0xdf   :  { %v190_v38 = vadd.f32 %v295_v35, %v180_v36 }
  0xe1   :  { %vm191_vm4 = vcmp.gt.f32.partialorder %v190_v38, 0.0  ;;  %v192_v39 = vmul.f32 0.2, %v190_v38 }
  0xe3   :  { %v193_v40 = vsel %vm191_vm4, %v190_v38, %v192_v39 }
  0xe4   :  { %364 = vmatmul.mubr.f32.vlgmr.msra.gmra.mrb[0].mxu0 %v193_v40 }
 0x1b7   :  { %v283_v42 = vpop.f32.mrb[0].mxu0 }
 0x1b8   :  { %v284_v43 = vadd.f32 %v296_v41, %v283_v42  ;;  %v365_v44 = vpop.f32.mrb[1].mxu0 }
 0x1ba   :  { %287 = vst.msk [vmem:[%s523_s7] sm:$0xff] %vm31_vm1, %v284_v43 }

</bundles_post_ra>
